<compile_context>
chip_gen: v5e
topology: v5e:2x2
jax: 0.10.0
libtpu: 0.0.40
codegen_flags: <defaults>
</compile_context>

<pallas_src>
import jax
import jax.numpy as jnp
from jax.experimental import pallas as pl
from jax.experimental.pallas import tpu as pltpu


def _round_up(x, m):
    return (x + m - 1) // m * m


def _fc_kernel(y_ref, wy_ref, b_ref, o_ref):
    # y_ref : [tm, D-1]     batch tile (streamed)
    # wy_ref: [D-1, n_out]  effective weight  (= W.T[1:, :D-1], maybe lane-padded)
    # b_ref : [1,   n_out]  effective bias    (= b[:D-1] + t * W[:D-1, 0]), f32
    acc = jnp.dot(y_ref[...], wy_ref[...], preferred_element_type=jnp.float32)
    o_ref[...] = (acc + b_ref[...]).astype(o_ref.dtype)


def simple_fc_forward(t, y, W, b, *, row_tile=2048, compute_dtype=None,
                      lane_pad_output=False):
    """Pallas forward for simple_fc_layer: linear(cat([t*1, y], 1))[:, :D-1]."""
    B, Dm1 = y.shape
    D = Dm1 + 1
    assert W.shape == (D, D), W.shape
    assert b.shape == (D,), b.shape

    out_dtype = y.dtype
    cdt = jnp.dtype(compute_dtype) if compute_dtype is not None else jnp.dtype(y.dtype)

    # --- one-time re-layout (traced ops; t stays a runtime value) ------------
    t_val = jnp.asarray(t, dtype=jnp.float32)
    w_y = jnp.transpose(W)[1:, :Dm1].astype(cdt)                    # [D-1, D-1]
    b_eff = (b[:Dm1].astype(jnp.float32)
             + t_val * W[:Dm1, 0].astype(jnp.float32))              # [D-1]

    n_out = Dm1
    if lane_pad_output:
        # Lane-dense output: pad the output feature dim to a multiple of 128 so
        # stores are unmasked vst; slice back outside the kernel.
        n_out = _round_up(Dm1, 128)
        w_y = jnp.pad(w_y, ((0, 0), (0, n_out - Dm1)))
        b_eff = jnp.pad(b_eff, (0, n_out - Dm1))
    b_eff = b_eff.reshape(1, n_out)

    y_in = y.astype(cdt)

    # --- row (batch) tiling ---------------------------------------------------
    if B <= row_tile:
        tm = B                                   # single whole-array block
    else:
        # big tiles, but keep >= 2 grid steps so the "parallel" axis can be
        # sharded across v7x's two TensorCores; tiles are multiples of 8 rows.
        tm = min(row_tile, _round_up(pl.cdiv(B, 2), 8))
    grid = (pl.cdiv(B, tm),)

    # --- VMEM budget: 2x y tile + 2x out tile + 1x weight slab + bias --------
    vmem_bytes = (2 * tm * Dm1 * cdt.itemsize
                  + 2 * tm * n_out * jnp.dtype(out_dtype).itemsize
                  + Dm1 * n_out * cdt.itemsize
                  + 2 * n_out * 4)
    vmem_limit = int(min(100 << 20, max(4 << 20, 2 * vmem_bytes)))

    cost = pl.CostEstimate(
        flops=2 * B * Dm1 * n_out,
        transcendentals=0,
        bytes_accessed=int(B * Dm1 * cdt.itemsize                    # y in
                           + B * n_out * jnp.dtype(out_dtype).itemsize  # out
                           + Dm1 * n_out * cdt.itemsize              # weights
                           + n_out * 4),                              # bias
    )

    out = pl.pallas_call(
        _fc_kernel,
        out_shape=jax.ShapeDtypeStruct((B, n_out), out_dtype),
        grid_spec=pltpu.PrefetchScalarGridSpec(
            num_scalar_prefetch=0,
            grid=grid,
            in_specs=[
                pl.BlockSpec((tm, Dm1), lambda i: (i, 0)),           # y tile (streamed)
                pl.BlockSpec((Dm1, n_out), lambda i: (0, 0),
                             pipeline_mode=pl.Buffered(1)),          # resident weight
                pl.BlockSpec((1, n_out), lambda i: (0, 0),
                             pipeline_mode=pl.Buffered(1)),          # effective bias
            ],
            out_specs=pl.BlockSpec((tm, n_out), lambda i: (i, 0)),
        ),
        compiler_params=pltpu.CompilerParams(
            dimension_semantics=("parallel",),
            vmem_limit_bytes=vmem_limit,
        ),
        cost_estimate=cost,
    )(y_in, w_y, b_eff)

    if lane_pad_output:
        out = out[:, :Dm1]
    return out


if __name__ == "__main__":
    input_dim = 32     # nn.Linear(dim, dim) with dim = input_dim
    batch = 8

    key = jax.random.PRNGKey(0)
    kw, kb, ky = jax.random.split(key, 3)
    W = (jax.random.normal(kw, (input_dim, input_dim), jnp.float32)
         * (1.0 / jnp.sqrt(input_dim)))
    b = jax.random.normal(kb, (input_dim,), jnp.float32) * 0.1
    y = jax.random.normal(ky, (batch, input_dim - 1), jnp.float32)
    t = 0.5

    # Pure-JAX reference (mirrors the PyTorch forward exactly).
    t_vec = jnp.ones((batch, 1), jnp.float32) * t
    t_and_y = jnp.concatenate([t_vec, y], axis=1)
    ref = (t_and_y @ W.T + b)[:, : input_dim - 1]

    # Default (streaming) path.
    out = jax.block_until_ready(simple_fc_forward(t, y, W, b))
    assert out.shape == ref.shape, (out.shape, ref.shape)
    assert jnp.allclose(out, ref, rtol=1e-5, atol=1e-5)

    # Lane-dense output path (small-B / latency regime), verified as well.
    out_pad = jax.block_until_ready(
        simple_fc_forward(t, y, W, b, lane_pad_output=True))
    assert out_pad.shape == ref.shape, (out_pad.shape, ref.shape)
    assert jnp.allclose(out_pad, ref, rtol=1e-5, atol=1e-5)

    print("KERNEL_OK")
</pallas_src>

<mosaic_0001>
module attributes {stable_mosaic.version = 11 : i64} {
  func.func @_fc_kernel(%arg0: i32, %arg1: memref<8x31xf32, #tpu.memory_space<vmem>>, %arg2: memref<31x31xf32, #tpu.memory_space<vmem>>, %arg3: memref<1x31xf32, #tpu.memory_space<vmem>>, %arg4: memref<8x31xf32, #tpu.memory_space<vmem>>) attributes {dimension_semantics = [#tpu.dimension_semantics<parallel>], iteration_bounds = array<i64: 1>, scalar_prefetch = 0 : i64, scratch_operands = 0 : i64, tpu.core_type = #tpu.core_type<tc>, window_params = [{transform_indices = @transform_0, window_bounds = array<i64: 8, 31>}, {pipeline_mode = #tpu.pipeline_mode<synchronous>, transform_indices = @transform_1, window_bounds = array<i64: 31, 31>}, {pipeline_mode = #tpu.pipeline_mode<synchronous>, transform_indices = @transform_2, window_bounds = array<i64: 1, 31>}, {transform_indices = @transform_3, window_bounds = array<i64: 8, 31>}]} {
    %c0 = arith.constant 0 : index
    %c0_0 = arith.constant 0 : index
    %0 = vector.load %arg1[%c0, %c0_0] : memref<8x31xf32, #tpu.memory_space<vmem>>, vector<8x31xf32>
    %c0_1 = arith.constant 0 : index
    %c0_2 = arith.constant 0 : index
    %1 = vector.load %arg2[%c0_1, %c0_2] : memref<31x31xf32, #tpu.memory_space<vmem>>, vector<31x31xf32>
    %cst = arith.constant dense<0.000000e+00> : vector<8x31xf32>
    %2 = tpu.matmul %0, %1, %cst {dimension_numbers = #tpu.dot_dimension_numbers<[1], [0], [0], [1], [0, 0, 1, 1], [], []>} : vector<8x31xf32>, vector<31x31xf32>, vector<8x31xf32> -> vector<8x31xf32>
    %c0_3 = arith.constant 0 : index
    %c0_4 = arith.constant 0 : index
    %3 = vector.load %arg3[%c0_3, %c0_4] : memref<1x31xf32, #tpu.memory_space<vmem>>, vector<1x31xf32>
    %4 = vector.broadcast %3 : vector<1x31xf32> to vector<8x31xf32>
    %5 = arith.addf %2, %4 : vector<8x31xf32>
    %c0_5 = arith.constant 0 : index
    %c0_6 = arith.constant 0 : index
    %6 = vector.load %arg4[%c0_5, %c0_6] : memref<8x31xf32, #tpu.memory_space<vmem>>, vector<8x31xf32>
    tpu.vector_store %arg4[%c0_5, %c0_6], %5 {strides = array<i32>} : memref<8x31xf32, #tpu.memory_space<vmem>>, vector<8x31xf32>,
    return
  }
  func.func @transform_0(%arg0: i32) -> (i32, i32) {
    %c0_i32 = arith.constant 0 : i32
    %c0_i32_0 = arith.constant 0 : i32
    return %arg0, %c0_i32 : i32, i32
  }
  func.func @transform_1(%arg0: i32) -> (i32, i32) {
    %c0_i32 = arith.constant 0 : i32
    %c0_i32_0 = arith.constant 0 : i32
    %c0_i32_1 = arith.constant 0 : i32
    return %c0_i32, %c0_i32_0 : i32, i32
  }
  func.func @transform_2(%arg0: i32) -> (i32, i32) {
    %c0_i32 = arith.constant 0 : i32
    %c0_i32_0 = arith.constant 0 : i32
    %c0_i32_1 = arith.constant 0 : i32
    return %c0_i32, %c0_i32_0 : i32, i32
  }
  func.func @transform_3(%arg0: i32) -> (i32, i32) {
    %c0_i32 = arith.constant 0 : i32
    %c0_i32_0 = arith.constant 0 : i32
    return %arg0, %c0_i32 : i32, i32
  }
}

</mosaic_0001>

<bundles_post_ra>
// kernel: tpu_custom_call.1
= control target key start
LH: loop header
LB: loop body
LE: loop exit
PB: predicated region body
PF: predicated region fallthrough
CT: control target
= control target key end

     0   :  { %8 = vsyncpa [#allocation3], 0  ;;  %s224_s0 = inlined_call_operand.hbm [shape: f32[8,31], index: 0, kind: input, shape index: {}]   ;;  %s225_s1 = inlined_call_operand.hbm [shape: f32[31,31], index: 1, kind: input, shape index: {}]   ;;  %s226_s2 = inlined_call_operand.vmem [shape: f32[1,31], index: 2, kind: input, shape index: {}]   ;;  %s227_s3 = inlined_call_operand.hbm [shape: f32[8,31], index: 3, kind: output, shape index: {}]  }
   0x1   :  { %9 = vsyncpa [#allocation6], 0 }
   0x2   :  { %10 = vsyncpa [#allocation4], 0  ;;  %s16_s14 = sshll.u32 %s224_s0, 4  ;;  %s187_s15 = smov [#allocation2]   ;;  %s17_s14 = int_to_ptr.hbm [resolvable:$true] %s16_s14 }
   0x3   :  { %s18_s16 = sshll.u32 %s187_s15, 4  ;;  %s26_s19 = sshll.u32 %s225_s1, 4  ;;  %s19_s16 = int_to_ptr.vmem [resolvable:$true] %s18_s16  ;;  %s27_s19 = int_to_ptr.hbm [resolvable:$true] %s26_s19 }
   0x4   :  { %21 = dma.hbm_to_vmem [thread:$0]  %s17_s14, 128, %s19_s16, [#allocation3]  }
   0x5   :  { %s188_s20 = smov [#allocation5]   ;;  %s189_s22 = smov 128  }
   0x6   :  { %s28_s21 = sshll.u32 %s188_s20, 4  ;;  %s190_s23 = smov 8   ;;  %s29_s21 = int_to_ptr.vmem [resolvable:$true] %s28_s21 }
   0x7   :  { %34 = dma.hbm_to_vmem [thread:$0]  %s27_s19, 512, %s29_s21, [#allocation6], %s189_s22, %s189_s22, %s190_s23  }
   0x8   :  { %181 = dma.done.wait [#allocation3], 128  }
   0x9   :  { %182 = vsyncadd [#allocation3], 4294967168 }
   0xa   :  { %183 = dma.done.wait [#allocation6], 512  }
   0xb   :  { %184 = vsyncadd [#allocation6], 4294966784  ;;  %vm58_vm0 = vcmask 1046528   ;;  %v49_v0 = vld [vmem:[#allocation5 + $0x18] sm:$0x7f]  ;;  %v48_v1 = vld [vmem:[#allocation5 + $0x10] sm:$0xff] }
   0xc   :  { %101 = vmatpush.msk.msra.mxu0 %vm58_vm0, %v49_v0  ;;  %v47_v2 = vld [vmem:[#allocation5 + $0x8] sm:$0xff]  ;;  %v46_v3 = vld [vmem:[#allocation5] sm:$0xff]  ;;  %v45_v4 = vld [vmem:[#allocation2] sm:$0xff]  ;;  %vm54_vm1 = vcmask 252928   ;;  %s191_s24 = smov [#allocation7]   ;;  %s90_s28 = sshll.u32 %s227_s3, 4  ;;  %s91_s28 = int_to_ptr.hbm [resolvable:$true] %s90_s28 }
   0xd   :  { %v108_v5 = vld [vmem:[%s226_s2] ss:$0 sm:$0xff]  ;;  %s88_s25 = sshll.u32 %s191_s24, 4  ;;  %s89_s25 = int_to_ptr.vmem [resolvable:$true] %s88_s25 }
   0xe   :  { %75 = vmatpush.msra.mxu0 %v48_v1 }
  0x10   :  { %76 = vmatpush.msra.mxu0 %v47_v2 }
  0x12   :  { %77 = vmatpush.msra.mxu0 %v46_v3 }
  0x13   :  { %102 = vmatmul.msk.f32.vlgmr.msra.gmra.mxu0 %vm54_vm1, %v45_v4 }
  0x90   :  { %v79_v6 = vpop.f32.mrf.mxu0 }
  0x91   :  { %v80_v7 = vadd.f32 %v108_v5, %v79_v6 }
  0x93   :  { %82 = vst.msk [vmem:[#allocation7] sm:$0xff] %vm54_vm1, %v80_v7 }
  0x94   :  { %93 = dma.vmem_to_hbm [thread:$0]  %s89_s25, 128, %s91_s28, [#allocation4]  }
  0x95   :  { %185 = dma.done.wait [#allocation4], 128  }
  0x96   :  { %186 = vsyncadd [#allocation4], 4294967168 }
  0x97   :  { %98 = vsyncpa [#allocation3], 1 }
  0x98   :  { %99 = vsyncpa [#allocation6], 1 }
  0x99   :  { %100 = vsyncpa [#allocation4], 1 }

</bundles_post_ra>
